<compile_context>
chip_gen: v7x
topology: tpu7x:2x2x1
jax: 0.10.0
libtpu: 0.0.40
codegen_flags: <defaults>
</compile_context>

<pallas_src>
import math

import jax
import jax.numpy as jnp
from jax.experimental import pallas as pl
from jax.experimental.pallas import tpu as pltpu


BN1_EPS = 2e-5
BN2_EPS = 2e-5


def _rup(v, m):
    return -(-v // m) * m


# ----------------------------------------------------------------------------- Pallas kernel


def _fc_bn_kernel(x_ref, w_ref, bsb_ref, nobn_ref, feat_ref):
    """grid = (M tiles, F tiles, K tiles); K (reduction) last, marked 'arbitrary'.

    x:    (tile_m, tile_k) bf16
    w:    (tile_k, tile_n) bf16   (bn1 already folded in)
    bsb:  (3, tile_n) f32         rows = [fc bias, bn2 scale, bn2 bias]
    nobn: (tile_m, tile_n) f32    accumulated in-place (resident across k)
    feat: (tile_m, tile_n) f32    written on the last k step
    """
    k = pl.program_id(2)

    @pl.when(k == 0)
    def _():
        # init the resident output block with the folded bias -> no scratch, no epilogue add
        nobn_ref[...] = jnp.broadcast_to(bsb_ref[0:1, :], nobn_ref.shape)

    nobn_ref[...] += jnp.dot(x_ref[...], w_ref[...], preferred_element_type=jnp.float32)

    @pl.when(k == pl.num_programs(2) - 1)
    def _():
        feat_ref[...] = nobn_ref[...] * bsb_ref[1:2, :] + bsb_ref[2:3, :]


def _fused_fc_bn(xp, wp, bsb, *, tile_m, tile_n, tile_k):
    Mp, Kp = xp.shape
    _, Fp = wp.shape
    grid = (Mp // tile_m, Fp // tile_n, Kp // tile_k)

    nobn, feat = pl.pallas_call(
        _fc_bn_kernel,
        out_shape=(
            jax.ShapeDtypeStruct((Mp, Fp), jnp.float32),
            jax.ShapeDtypeStruct((Mp, Fp), jnp.float32),
        ),
        grid_spec=pltpu.PrefetchScalarGridSpec(
            num_scalar_prefetch=0,
            grid=grid,
            in_specs=[
                pl.BlockSpec((tile_m, tile_k), lambda i, j, k: (i, k)),
                pl.BlockSpec((tile_k, tile_n), lambda i, j, k: (k, j)),
                pl.BlockSpec((3, tile_n), lambda i, j, k: (0, j)),
            ],
            out_specs=(
                pl.BlockSpec((tile_m, tile_n), lambda i, j, k: (i, j)),
                pl.BlockSpec((tile_m, tile_n), lambda i, j, k: (i, j)),
            ),
        ),
        compiler_params=pltpu.CompilerParams(
            dimension_semantics=("parallel", "parallel", "arbitrary"),
        ),
    )(xp, wp, bsb)
    return nobn, feat


# ----------------------------------------------------------------------------- module forward


def make_fc_E_forward(params, in_feature, in_h, in_w):
    """Fold eval-mode bn1 into fc, cast+pad once (hoisted), return jitted forward(x)."""
    C, H, W = in_feature, in_h, in_w
    D = C * H * W
    F = int(params["fc_w"].shape[0])

    # --- fold bn1 (eval-mode per-channel affine) exactly into the linear layer (done once)
    s1 = params["bn1_gamma"] * jax.lax.rsqrt(params["bn1_var"] + BN1_EPS)      # (C,)
    o1 = params["bn1_beta"] - params["bn1_mean"] * s1                          # (C,)
    s1_flat = jnp.repeat(s1, H * W)                                            # (D,), flatten order (C,H,W)
    o1_flat = jnp.repeat(o1, H * W)
    w_t = params["fc_w"].T                                                     # (D, F)
    w_folded = w_t * s1_flat[:, None]
    b_folded = params["fc_b"] + o1_flat @ w_t                                  # (F,)

    # Dropout2d(p=0.4, inplace=True): eval mode => identity.
    # TODO(synk): training-mode channel dropout (would need pltpu.prng_*) not implemented.

    # --- bn2: BatchNorm1d(affine=False), eval mode
    s2 = jax.lax.rsqrt(params["bn2_var"] + BN2_EPS)                            # (F,)
    b2 = -params["bn2_mean"] * s2                                              # (F,)

    # --- static tile selection (Python ints from shapes only)
    Fp128 = _rup(F, 128)
    tile_n = 256 if Fp128 >= 512 else 128        # keep >=2 parallel F tiles (v7x: 2 TCs)
    Fp = _rup(F, tile_n)
    Kp256 = _rup(D, 256)
    tile_k = Kp256 if Kp256 <= 2048 else 1024    # single K step for small D (no K loop)
    Kp = _rup(D, tile_k)

    # --- cast + pad weight/bias once (hoisted out of the hot path)
    wp = jnp.zeros((Kp, Fp), jnp.bfloat16).at[:D, :F].set(w_folded.astype(jnp.bfloat16))
    bsb = (
        jnp.zeros((3, Fp), jnp.float32)
        .at[0, :F].set(b_folded.astype(jnp.float32))
        .at[1, :F].set(s2.astype(jnp.float32))
        .at[2, :F].set(b2.astype(jnp.float32))
    )

    def forward(x, wp, bsb):
        N = x.shape[0]
        M16 = _rup(N, 16)                        # bf16 packs 16 sublanes per vreg
        tile_m = M16 if M16 <= 256 else 256      # bounded VMEM when M grows (v7x 64 MiB)
        Mp = _rup(M16, tile_m)
        xp = jnp.zeros((Mp, Kp), jnp.bfloat16).at[:N, :D].set(
            x.reshape(N, D).astype(jnp.bfloat16))
        nobn, feat = _fused_fc_bn(xp, wp, bsb, tile_m=tile_m, tile_n=tile_n, tile_k=tile_k)
        return {"feature_nobn": nobn[:N, :F], "feature": feat[:N, :F]}

    fwd = jax.jit(forward)
    return lambda x: fwd(x, wp, bsb)


# ----------------------------------------------------------------------------- parameters / ref


def make_params(key, in_feature, in_h, in_w, out_feature):
    D = in_feature * in_h * in_w
    ks = jax.random.split(key, 8)
    return {
        "bn1_gamma": 1.0 + 0.1 * jax.random.normal(ks[0], (in_feature,), jnp.float32),
        "bn1_beta": 0.1 * jax.random.normal(ks[1], (in_feature,), jnp.float32),
        "bn1_mean": 0.1 * jax.random.normal(ks[2], (in_feature,), jnp.float32),
        "bn1_var": jax.random.uniform(ks[3], (in_feature,), jnp.float32, 0.5, 1.5),
        "fc_w": jax.random.normal(ks[4], (out_feature, D), jnp.float32) / math.sqrt(D),
        "fc_b": 0.1 * jax.random.normal(ks[5], (out_feature,), jnp.float32),
        "bn2_mean": 0.1 * jax.random.normal(ks[6], (out_feature,), jnp.float32),
        "bn2_var": jax.random.uniform(ks[7], (out_feature,), jnp.float32, 0.5, 1.5),
    }


def reference_forward(x, params):
    """Pure-JAX f32 reference mirroring the PyTorch module (eval mode)."""
    N = x.shape[0]
    s1 = params["bn1_gamma"] / jnp.sqrt(params["bn1_var"] + BN1_EPS)
    xb = (x - params["bn1_mean"][None, :, None, None]) * s1[None, :, None, None] \
         + params["bn1_beta"][None, :, None, None]
    xf = xb.reshape(N, -1)
    nobn = xf @ params["fc_w"].T + params["fc_b"]
    feat = (nobn - params["bn2_mean"]) / jnp.sqrt(params["bn2_var"] + BN2_EPS)
    return nobn, feat


# ----------------------------------------------------------------------------- main


if __name__ == "__main__":
    key = jax.random.PRNGKey(0)
    k_param, k_input = jax.random.split(key)

    # get_fc_E(in_feature=4, in_h=16, in_w=16, out_feature=256)  -> D = 1024
    B, C, H, W, F = 2, 4, 16, 16, 256
    params = make_params(k_param, C, H, W, F)
    x = jax.random.normal(k_input, (B, C, H, W), jnp.float32)     # NCHW like PyTorch

    fc_E = make_fc_E_forward(params, C, H, W)   # weight fold / cast / pad happen ONCE here
    out = fc_E(x)
    out = jax.block_until_ready(out)

    assert out["feature_nobn"].shape == (B, F), out["feature_nobn"].shape
    assert out["feature"].shape == (B, F), out["feature"].shape
    assert bool(jnp.all(jnp.isfinite(out["feature_nobn"])))
    assert bool(jnp.all(jnp.isfinite(out["feature"])))

    ref_nobn, ref_feat = reference_forward(x, params)
    assert float(jnp.max(jnp.abs(out["feature_nobn"] - ref_nobn))) < 5e-2
    assert float(jnp.max(jnp.abs(out["feature"] - ref_feat))) < 5e-2

    print("KERNEL_OK")
</pallas_src>

<mosaic_0001>
module attributes {stable_mosaic.version = 11 : i64} {
  func.func @_fc_bn_kernel(%arg0: i32, %arg1: i32, %arg2: i32, %arg3: memref<16x1024xbf16, #tpu.memory_space<vmem>>, %arg4: memref<1024x128xbf16, #tpu.memory_space<vmem>>, %arg5: memref<3x128xf32, #tpu.memory_space<vmem>>, %arg6: memref<16x128xf32, #tpu.memory_space<vmem>>, %arg7: memref<16x128xf32, #tpu.memory_space<vmem>>) attributes {dimension_semantics = [#tpu.dimension_semantics<parallel>, #tpu.dimension_semantics<parallel>, #tpu.dimension_semantics<arbitrary>], iteration_bounds = array<i64: 1, 2, 1>, scalar_prefetch = 0 : i64, scratch_operands = 0 : i64, tpu.core_type = #tpu.core_type<tc>, window_params = [{transform_indices = @transform_0, window_bounds = array<i64: 16, 1024>}, {transform_indices = @transform_1, window_bounds = array<i64: 1024, 128>}, {transform_indices = @transform_2, window_bounds = array<i64: 3, 128>}, {transform_indices = @transform_3, window_bounds = array<i64: 16, 128>}, {transform_indices = @transform_4, window_bounds = array<i64: 16, 128>}]} {
    %c0_i32 = arith.constant 0 : i32
    %0 = arith.cmpi eq, %arg2, %c0_i32 : i32
    %1 = arith.extui %0 : i1 to i32
    %c0_i32_0 = arith.constant 0 : i32
    %2 = arith.cmpi ne, %1, %c0_i32_0 : i32
    scf.if %2 {
      %c0_10 = arith.constant 0 : index
      %c0_11 = arith.constant 0 : index
      %12 = vector.load %arg5[%c0_10, %c0_11] : memref<3x128xf32, #tpu.memory_space<vmem>>, vector<1x128xf32>
      %13 = vector.shape_cast %12 : vector<1x128xf32> to vector<1x128xf32>
      %14 = vector.broadcast %13 : vector<1x128xf32> to vector<16x128xf32>
      %c0_12 = arith.constant 0 : index
      %c0_13 = arith.constant 0 : index
      %15 = vector.load %arg6[%c0_12, %c0_13] : memref<16x128xf32, #tpu.memory_space<vmem>>, vector<16x128xf32>
      tpu.vector_store %arg6[%c0_12, %c0_13], %14 {strides = array<i32>} : memref<16x128xf32, #tpu.memory_space<vmem>>, vector<16x128xf32>,
    } else {
    }
    %c0 = arith.constant 0 : index
    %c0_1 = arith.constant 0 : index
    %3 = vector.load %arg6[%c0, %c0_1] : memref<16x128xf32, #tpu.memory_space<vmem>>, vector<16x128xf32>
    %c0_2 = arith.constant 0 : index
    %c0_3 = arith.constant 0 : index
    %4 = vector.load %arg3[%c0_2, %c0_3] : memref<16x1024xbf16, #tpu.memory_space<vmem>>, vector<16x1024xbf16>
    %c0_4 = arith.constant 0 : index
    %c0_5 = arith.constant 0 : index
    %5 = vector.load %arg4[%c0_4, %c0_5] : memref<1024x128xbf16, #tpu.memory_space<vmem>>, vector<1024x128xbf16>
    %cst = arith.constant dense<0.000000e+00> : vector<16x128xf32>
    %6 = tpu.matmul %4, %5, %cst {dimension_numbers = #tpu.dot_dimension_numbers<[1], [0], [0], [1], [0, 0, 1, 1], [], []>} : vector<16x1024xbf16>, vector<1024x128xbf16>, vector<16x128xf32> -> vector<16x128xf32>
    %7 = arith.addf %3, %6 : vector<16x128xf32>
    %c0_6 = arith.constant 0 : index
    %c0_7 = arith.constant 0 : index
    %8 = vector.load %arg6[%c0_6, %c0_7] : memref<16x128xf32, #tpu.memory_space<vmem>>, vector<16x128xf32>
    tpu.vector_store %arg6[%c0_6, %c0_7], %7 {strides = array<i32>} : memref<16x128xf32, #tpu.memory_space<vmem>>, vector<16x128xf32>,
    %c0_i32_8 = arith.constant 0 : i32
    %9 = arith.cmpi eq, %arg2, %c0_i32_8 : i32
    %10 = arith.extui %9 : i1 to i32
    %c0_i32_9 = arith.constant 0 : i32
    %11 = arith.cmpi ne, %10, %c0_i32_9 : i32
    scf.if %11 {
      %c0_10 = arith.constant 0 : index
      %c0_11 = arith.constant 0 : index
      %12 = vector.load %arg6[%c0_10, %c0_11] : memref<16x128xf32, #tpu.memory_space<vmem>>, vector<16x128xf32>
      %c1 = arith.constant 1 : index
      %c0_12 = arith.constant 0 : index
      %13 = vector.load %arg5[%c1, %c0_12] : memref<3x128xf32, #tpu.memory_space<vmem>>, vector<1x128xf32>
      %14 = vector.broadcast %13 : vector<1x128xf32> to vector<16x128xf32>
      %15 = arith.mulf %12, %14 : vector<16x128xf32>
      %c2 = arith.constant 2 : index
      %c0_13 = arith.constant 0 : index
      %16 = vector.load %arg5[%c2, %c0_13] : memref<3x128xf32, #tpu.memory_space<vmem>>, vector<1x128xf32>
      %17 = vector.broadcast %16 : vector<1x128xf32> to vector<16x128xf32>
      %18 = arith.addf %15, %17 : vector<16x128xf32>
      %c0_14 = arith.constant 0 : index
      %c0_15 = arith.constant 0 : index
      %19 = vector.load %arg7[%c0_14, %c0_15] : memref<16x128xf32, #tpu.memory_space<vmem>>, vector<16x128xf32>
      tpu.vector_store %arg7[%c0_14, %c0_15], %18 {strides = array<i32>} : memref<16x128xf32, #tpu.memory_space<vmem>>, vector<16x128xf32>,
    } else {
    }
    return
  }
  func.func @transform_0(%arg0: i32, %arg1: i32, %arg2: i32) -> (i32, i32) {
    %c0_i32 = arith.constant 0 : i32
    return %arg0, %arg2 : i32, i32
  }
  func.func @transform_1(%arg0: i32, %arg1: i32, %arg2: i32) -> (i32, i32) {
    %c0_i32 = arith.constant 0 : i32
    return %arg2, %arg1 : i32, i32
  }
  func.func @transform_2(%arg0: i32, %arg1: i32, %arg2: i32) -> (i32, i32) {
    %c0_i32 = arith.constant 0 : i32
    %c0_i32_0 = arith.constant 0 : i32
    return %c0_i32, %arg1 : i32, i32
  }
  func.func @transform_3(%arg0: i32, %arg1: i32, %arg2: i32) -> (i32, i32) {
    %c0_i32 = arith.constant 0 : i32
    return %arg0, %arg1 : i32, i32
  }
  func.func @transform_4(%arg0: i32, %arg1: i32, %arg2: i32) -> (i32, i32) {
    %c0_i32 = arith.constant 0 : i32
    return %arg0, %arg1 : i32, i32
  }
}

</mosaic_0001>

<bundles_post_ra>
// kernel: forward.1
= control target key start
LH: loop header
LB: loop body
LE: loop exit
PB: predicated region body
PF: predicated region fallthrough
CT: control target
= control target key end

     0   :  { %10 = vsyncpa [#allocation3], 0  ;;  %s1957_s0 = inlined_call_operand.vmem [shape: bf16[16,1024], index: 0, kind: input, shape index: {}]   ;;  %s1958_s1 = inlined_call_operand.hbm [shape: bf16[1024,256], index: 1, kind: input, shape index: {}]   ;;  %s1959_s2 = inlined_call_operand.vmem [shape: f32[3,256], index: 2, kind: input, shape index: {}]   ;;  %s1960_s3 = inlined_call_operand.vmem [shape: f32[16,256], index: 3, kind: output, shape index: {0}]   ;;  %s1961_s4 = inlined_call_operand.vmem [shape: f32[16,256], index: 4, kind: output, shape index: {1}]  }
   0x1   :  { %12 = vsyncpa [#allocation3 + $0x1], 0  ;;  %s1720_s15 = smov 0   ;;  %s1722_s16 = smov 0  }
   0x2   :  { %s1724_s17 = smov 0   ;;  %s1726_s18 = smov 0  }
   0x3   :  { %s1728_s19 = smov 0   ;;  %s1730_s20 = smov 0  }
   0x4 LB: > { %s1306_s21 = sadd.s32 4294967295, %s1689_s20   ;;  %s33_s22 = sadd.s32 1, %s1685_s19  ;;  %s1689_s20 = sphi %s1730_s20, %s18_s20   ;;  %s1685_s19 = sphi %s1728_s19, %s1973_s19   ;;  %s1681_s18 = sphi %s1726_s18, %s1972_s18   ;;  %s1677_s17 = sphi %s1724_s17, %s1971_s17   ;;  %s1673_s16 = sphi %s1722_s16, %s1970_s16   ;;  %s1669_s15 = sphi %s1720_s15, %s1969_s15  }
   0x5   : > { %p35_p0 = scmp.ge.s32.totalorder %s33_s22, 2  ;;  %s74_s23 = sadd.s32 1, %s1677_s17 }
   0x6   : > { %p81_p1 = scmp.ne.s32.totalorder %s1677_s17, %s1673_s16  ;;  %p82_p2 = scmp.eq.s32.totalorder %s1689_s20, 0 }
   0x7   : > { %s1975_s22 = smov (%p35_p0, %s33_s22), 0  ;;  %p87_p4 = scmp.ne.s32.totalorder %s1673_s16, %s1669_s15 }
   0x8   : > { %p1756_p3 = por %p82_p2, %p81_p1  ;;  %s70_s25 = ssub.s32 %s1685_s19, %s1975_s22 }
   0x9   : > { %p88_p5 = scmp.eq.s32.totalorder %s1306_s21, 0  ;;  %p72_p6 = scmp.eq.s32.totalorder %s70_s25, 0 }
   0xa   : > { %p139_p7 = scmp.eq.s32.totalorder %s1306_s21, 1  ;;  %p1493_p10 = scmp.lt.s32.totalorder %s1689_s20, 2 }
   0xb   : > { %p1763_p8 = por %p88_p5, %p87_p4  ;;  %s208_s29 = sand.u32 1, %s1677_s17  }
   0xc   : > { %s1768_s27 = scalar_select %p72_p6, %s1677_s17, %s74_s23  }
   0xd   : > { %p1770_p9 = por %p139_p7, %p81_p1  ;;  %s1312_s30 = sshll.u32 %s1685_s19, 6 }
   0xe   : > { %s1311_s5 = sshll.u32 %s208_s29, 9  ;;  %s1780_s8 = scalar_lea.hbm %s1958_s1, %s1312_s30 }
   0xf   : > { %s1964_s28 = scalar_select %p1770_p9, 1, 0 }
  0x10   : > { %s212_s9 = scalar_lea.vmem [#allocation2], %s1311_s5  ;;  %p1784_p11 = pnand %p1493_p10, %p1756_p3 }
  0x11   : > { %s221_s10 = sshll.u32 %s212_s9, 4  ;;  %s1791_s12 = scalar_lea.sflag [#allocation3], %s208_s29  ;;  %s1788_s10 = int_to_ptr.vmem [resolvable:$true] %s221_s10 }
  0x12   : > { %s1609_s13 = scalar_lea.hbm %s1780_s8, 8192  ;;  %p1611_p0 = pneg %p1784_p11 }
  0x13   : > { %p1610_p13 = scmp.ne.s32.totalorder %s1780_s8, %s1609_s13  ;;  %s1614_s21 = scalar_lea.hbm %s1958_s1, 16384 }
  0x14   : > { %p1615_p3 = scmp.lt.u32.totalorder %s1780_s8, %s1958_s1  ;;  %p1616_p4 = scmp.lt.u32.totalorder %s1614_s21, %s1609_s13 }
  0x15   : > { %p1612_p1 = pnand %p1611_p0, %p1610_p13  ;;  %p1618_p6 = scmp.lt.u32.totalorder %s1609_s13, %s1780_s8 }
  0x16   : > { %p1617_p5 = por %p1616_p4, %p1615_p3 }
  0x17   : > { %p1613_p2 = pneg %p1612_p1 }
  0x18   : > { %p1619_p7 = por %p1618_p6, %p1617_p5 }
  0x1a   : > { %p1620_p10 = pnand %p1619_p7, %p1613_p2 }
  0x1c   : > { %1623 = shalt.err (!%p1620_p10)
}
  0x1d   : > { %s1624_s25 = scalar_lea.vmem %s1788_s10, 8192  ;;  %s1691_s29 = smov [#allocation2]  }
  0x1e   : > { %p1625_p13 = scmp.ne.s32.totalorder %s1788_s10, %s1624_s25  ;;  %s1629_s30 = sshll.u32 %s1691_s29, 4  ;;  %s1630_s30 = int_to_ptr.vmem [resolvable:$false] %s1629_s30 }
  0x1f   : > { %s1631_s5 = scalar_lea.vmem %s1630_s30, 16384  ;;  %p1632_p9 = scmp.lt.s32.totalorder %s1788_s10, %s1630_s30 }
  0x20   : > { %p1627_p1 = pnand %p1625_p13, %p1611_p0  ;;  %p1633_p3 = scmp.lt.s32.totalorder %s1631_s5, %s1624_s25 }
  0x22   : > { %p1628_p12 = pneg %p1627_p1  ;;  %p1634_p4 = por %p1633_p3, %p1632_p9 }
  0x24   : > { %p1635_p5 = pnand %p1634_p4, %p1628_p12 }
  0x26   : > { %1638 = shalt.err (!%p1635_p5)
}
  0x27   : > { %s1692_s6 = smov 128   ;;  %s1693_s7 = smov 64  }
  0x28   : > { %s1694_s9 = smov 4   ;;  %p236_p0 = scmp.lt.s32.totalorder %s1689_s20, 3 }
  0x29   : > { %1492 = dma.hbm_to_vmem [thread:$0]  (!%p1784_p11), %s1780_s8, 8192, %s1788_s10, %s1791_s12, %s1692_s6, %s1693_s7, %s1694_s9  }
  0x2a   : > { %p1966_p2 = scmp.ge.s32.totalorder %s1689_s20, 1 }
  0x2c   : > { %p237_p6 = pnand %p1966_p2, %p236_p0 }
  0x2d   : > { %s1823_s13 = sand.u32 (!%p237_p6), 1, %s1673_s16  }
  0x2e   : > { %240 = sbr.rel (%p237_p6) target bundleno = 361 (0x169), region = 32  ;;  %s1314_s14 = sshll.u32 (!%p237_p6), %s1823_s13, 9 }
  0x2f   : > { %s243_s15 = scalar_lea.sflag (!%p237_p6), [#allocation3], %s1823_s13  ;;  %s1827_s21 = scalar_lea.vmem (!%p237_p6), [#allocation2], %s1314_s14 }
  0x35   : > { %1664 = dma.done.wait (%p1763_p8), %s243_s15, 8192  }
  0x36   : > { %1666 = vsyncadd (%p1763_p8), %s243_s15, 4294959104  ;;  %v1545_v0 = vld [vmem:[%s1827_s21 + $0x40] sm:$0xff]   ;;  %v1549_v4 = vld [vmem:[%s1827_s21 + $0x48] sm:$0xff]   ;;  %p301_p8 = scmp.lt.s32.totalorder %s1681_s18, 1  ;;  %s1315_s12 = sshll.u32 %s1823_s13, 4 }
  0x37   : > { %v1546_v1 = vld [vmem:[%s1827_s21 + $0xc0] sm:$0xff]   ;;  %1399 = vmatprep.subr.bf16.mxu0 %v1545_v0  ;;  %v1550_v5 = vld [vmem:[%s1827_s21 + $0xc8] sm:$0xff]   ;;  %v1553_v8 = vld [vmem:[%s1827_s21 + $0x50] sm:$0xff]   ;;  %s281_s23 = scalar_lea.vmem [#allocation4], %s1315_s12  ;;  %s287_s24 = scalar_lea.vmem [#allocation5], %s1315_s12 }
  0x38   : > { %v1547_v2 = vld [vmem:[%s1827_s21] sm:$0xff]   ;;  %1421 = vmatprep.subr.bf16.mxu1 %v1546_v1  ;;  %v1551_v6 = vld [vmem:[%s1827_s21 + $0x8] sm:$0xff]   ;;  %v1554_v9 = vld [vmem:[%s1827_s21 + $0xd0] sm:$0xff]   ;;  %p1967_p9 = scmp.ne.s32.totalorder %s1964_s28, 0 }
  0x39   : > { %v1548_v3 = vld [vmem:[%s1827_s21 + $0x80] sm:$0xff]   ;;  %1400 = vmatpush3.bf16.msra.mxu0 %v1547_v2  ;;  %v1552_v7 = vld [vmem:[%s1827_s21 + $0x88] sm:$0xff]   ;;  %v1555_v10 = vld [vmem:[%s1827_s21 + $0x10] sm:$0xff]   ;;  %s1395_s13 = sshll.u32 (%p1967_p9), %s1681_s18, 3 }
  0x3a   : > { %1422 = vmatpush3.bf16.msra.mxu1 %v1548_v3  ;;  %1401 = vmatprep.subr.bf16.mxu0 %v1549_v4  ;;  %v1556_v11 = vld [vmem:[%s1827_s21 + $0x90] sm:$0xff]   ;;  %v1557_v12 = vld [vmem:[%s1827_s21 + $0x58] sm:$0xff]   ;;  %v1561_v16 = vld [vmem:[%s1827_s21 + $0x60] sm:$0xff]   ;;  %s1085_s30 = scalar_lea.vmem (%p1967_p9), %s1960_s3, %s1395_s13 }
  0x3b   : > { %1423 = vmatprep.subr.bf16.mxu1 %v1550_v5  ;;  %v1558_v13 = vld [vmem:[%s1827_s21 + $0xd8] sm:$0xff]   ;;  %v1562_v17 = vld [vmem:[%s1827_s21 + $0xe0] sm:$0xff]   ;;  %v1565_v20 = vld [vmem:[%s1827_s21 + $0x68] sm:$0xff]  }
  0x3c   : > { %v1559_v14 = vld [vmem:[%s1827_s21 + $0x18] sm:$0xff]   ;;  %v1563_v18 = vld [vmem:[%s1827_s21 + $0x20] sm:$0xff]   ;;  %v1566_v21 = vld [vmem:[%s1827_s21 + $0xe8] sm:$0xff]  }
  0x3d   : > { %1402 = vmatpush3.bf16.msra.mxu0 %v1551_v6  ;;  %v1560_v15 = vld [vmem:[%s1827_s21 + $0x98] sm:$0xff]   ;;  %v1564_v19 = vld [vmem:[%s1827_s21 + $0xa0] sm:$0xff]   ;;  %v1567_v22 = vld [vmem:[%s1827_s21 + $0x28] sm:$0xff]  }
  0x3e   : > { %1424 = vmatpush3.bf16.msra.mxu1 %v1552_v7  ;;  %1403 = vmatprep.subr.bf16.mxu0 %v1553_v8  ;;  %v1568_v23 = vld [vmem:[%s1827_s21 + $0xa8] sm:$0xff]   ;;  %v1569_v24 = vld [vmem:[%s1827_s21 + $0x70] sm:$0xff]   ;;  %v1573_v28 = vld [vmem:[%s1827_s21 + $0x78] sm:$0xff]  }
  0x3f   : > { %1425 = vmatprep.subr.bf16.mxu1 %v1554_v9  ;;  %v1570_v25 = vld [vmem:[%s1827_s21 + $0xf0] sm:$0xff]   ;;  %v1574_v29 = vld [vmem:[%s1827_s21 + $0xf8] sm:$0xff]   ;;  %v321_v32 = vld [vmem:[%s1957_s0] sm:$0xff] }
  0x40   : > { %v1571_v26 = vld [vmem:[%s1827_s21 + $0x30] sm:$0xff]   ;;  %v1575_v30 = vld [vmem:[%s1827_s21 + $0x38] sm:$0xff]   ;;  %v325_v33 = vld [vmem:[%s1957_s0 + $0x20] sm:$0xff] }
  0x41   : > { %1404 = vmatpush3.bf16.msra.mxu0 %v1555_v10  ;;  %v1572_v27 = vld [vmem:[%s1827_s21 + $0xb0] sm:$0xff]   ;;  %v1576_v31 = vld [vmem:[%s1827_s21 + $0xb8] sm:$0xff]   ;;  %v322_v34 = vld [vmem:[%s1957_s0 + $0x8] sm:$0xff]  ;;  %v1319_v35 = vcombine.low %v321_v32, %v325_v33  ;;  %v1320_v36 = vcombine.high %v321_v32, %v325_v33 }
  0x42   : > { %1426 = vmatpush3.bf16.msra.mxu1 %v1556_v11  ;;  %1405 = vmatprep.subr.bf16.mxu0 %v1557_v12  ;;  %v326_v37 = vld [vmem:[%s1957_s0 + $0x28] sm:$0xff]  ;;  %v1577_v40 = vld [vmem:[%s1827_s21 + $0x140] sm:$0xff]   ;;  %v1585_v48 = vld [vmem:[%s1827_s21 + $0x150] sm:$0xff]  }
  0x43   : > { %1427 = vmatprep.subr.bf16.mxu1 %v1558_v13  ;;  %v1321_v38 = vcombine.low %v322_v34, %v326_v37  ;;  %v1322_v39 = vcombine.high %v322_v34, %v326_v37  ;;  %913 = vmatprep.mubr.bf16.mxu0 %v1320_v36  ;;  %v1578_v41 = vld [vmem:[%s1827_s21 + $0x1c0] sm:$0xff]   ;;  %v1581_v44 = vld [vmem:[%s1827_s21 + $0x148] sm:$0xff]   ;;  %v1586_v49 = vld [vmem:[%s1827_s21 + $0x1d0] sm:$0xff]  }
  0x44   : > { %v1579_v42 = vld [vmem:[%s1827_s21 + $0x100] sm:$0xff]   ;;  %v1582_v45 = vld [vmem:[%s1827_s21 + $0x1c8] sm:$0xff]   ;;  %v1587_v50 = vld [vmem:[%s1827_s21 + $0x110] sm:$0xff]  }
  0x45   : > { %1406 = vmatpush3.bf16.msra.mxu0 %v1559_v14  ;;  %954 = vmatprep.mubr.bf16.mxu1 %v1322_v39  ;;  %v1580_v43 = vld [vmem:[%s1827_s21 + $0x180] sm:$0xff]   ;;  %v1583_v46 = vld [vmem:[%s1827_s21 + $0x108] sm:$0xff]   ;;  %v1588_v51 = vld [vmem:[%s1827_s21 + $0x190] sm:$0xff]  }
  0x46   : > { %1428 = vmatpush3.bf16.msra.mxu1 %v1560_v15  ;;  %1407 = vmatprep.subr.bf16.mxu0 %v1561_v16  ;;  %v1584_v47 = vld [vmem:[%s1827_s21 + $0x188] sm:$0xff]   ;;  %v1589_v52 = vld [vmem:[%s1827_s21 + $0x158] sm:$0xff]   ;;  %v1593_v56 = vld [vmem:[%s1827_s21 + $0x160] sm:$0xff]  }
  0x47   : > { %1429 = vmatprep.subr.bf16.mxu1 %v1562_v17  ;;  %v1590_v53 = vld [vmem:[%s1827_s21 + $0x1d8] sm:$0xff]   ;;  %v1594_v57 = vld [vmem:[%s1827_s21 + $0x1e0] sm:$0xff]   ;;  %v1597_v60 = vld [vmem:[%s1827_s21 + $0x168] sm:$0xff]  }
  0x48   : > { %v1591_v54 = vld [vmem:[%s1827_s21 + $0x118] sm:$0xff]   ;;  %v1595_v58 = vld [vmem:[%s1827_s21 + $0x120] sm:$0xff]   ;;  %v1598_v61 = vld [vmem:[%s1827_s21 + $0x1e8] sm:$0xff]  }
  0x49   : > { %1408 = vmatpush3.bf16.msra.mxu0 %v1563_v18  ;;  %v1592_v55 = vld [vmem:[%s1827_s21 + $0x198] sm:$0xff]   ;;  %v1596_v59 = vld [vmem:[%s1827_s21 + $0x1a0] sm:$0xff]   ;;  %v1599_v62 = vld [vmem:[%s1827_s21 + $0x128] sm:$0xff]  }
  0x4a   : > { %1430 = vmatpush3.bf16.msra.mxu1 %v1564_v19  ;;  %1409 = vmatprep.subr.bf16.mxu0 %v1565_v20  ;;  %v1600_v63 = vld [vmem:[%s1827_s21 + $0x1a8] sm:$0xff]   ;;  %v1601_v0 = vld [vmem:[%s1827_s21 + $0x170] sm:$0xff]   ;;  %v1605_v4 = vld [vmem:[%s1827_s21 + $0x178] sm:$0xff]  }
  0x4b   : > { %1431 = vmatprep.subr.bf16.mxu1 %v1566_v21  ;;  %v1602_v1 = vld [vmem:[%s1827_s21 + $0x1f0] sm:$0xff]   ;;  %v1606_v5 = vld [vmem:[%s1827_s21 + $0x1f8] sm:$0xff]  }
  0x4c   : > { %v1603_v2 = vld [vmem:[%s1827_s21 + $0x130] sm:$0xff]   ;;  %v1607_v6 = vld [vmem:[%s1827_s21 + $0x138] sm:$0xff]  }
  0x4d   : > { %1410 = vmatpush3.bf16.msra.mxu0 %v1567_v22  ;;  %v1604_v3 = vld [vmem:[%s1827_s21 + $0x1b0] sm:$0xff]   ;;  %v1608_v7 = vld [vmem:[%s1827_s21 + $0x1b8] sm:$0xff]   ;;  %s302_s21 = scalar_select %p301_p8, %s1681_s18, 1 }
  0x4e   : > { %1432 = vmatpush3.bf16.msra.mxu1 %v1568_v23  ;;  %1411 = vmatprep.subr.bf16.mxu0 %v1569_v24  ;;  %v323_v8 = vld [vmem:[%s1957_s0 + $0x10] sm:$0xff]  ;;  %v324_v12 = vld [vmem:[%s1957_s0 + $0x18] sm:$0xff] }
  0x4f   : > { %1433 = vmatprep.subr.bf16.mxu1 %v1570_v25  ;;  %v327_v9 = vld [vmem:[%s1957_s0 + $0x30] sm:$0xff]  ;;  %v328_v13 = vld [vmem:[%s1957_s0 + $0x38] sm:$0xff]  ;;  %s1317_s26 = sshll.u32 %s302_s21, 2 }
  0x50   : > { %v1323_v10 = vcombine.low %v323_v8, %v327_v9  ;;  %v1324_v11 = vcombine.high %v323_v8, %v327_v9  ;;  %v1325_v14 = vcombine.low %v324_v12, %v328_v13  ;;  %v1326_v15 = vcombine.high %v324_v12, %v328_v13  ;;  %s304_s11 = scalar_lea.vmem %s1959_s2, %s1317_s26 }
  0x51   : > { %1412 = vmatpush3.bf16.msra.mxu0 %v1571_v26 }
  0x52   : > { %1434 = vmatpush3.bf16.msra.mxu1 %v1572_v27  ;;  %1413 = vmatprep.subr.bf16.mxu0 %v1573_v28 }
  0x53   : > { %1435 = vmatprep.subr.bf16.mxu1 %v1574_v29 }
  0x55   : > { %1414 = vmatpush3.bf16.msra.mxu0 %v1575_v30 }
  0x56   : > { %1436 = vmatpush3.bf16.msra.mxu1 %v1576_v31  ;;  %1443 = vmatprep.subr.bf16.mxu0 %v1577_v40 }
  0x57   : > { %1465 = vmatprep.subr.bf16.mxu1 %v1578_v41 }
  0x58   : > { %914 = vmatmul.mubr.bf16.vlgmr.msra.gmra.mrb[0].mxu0 %v1319_v35 }
  0x59   : > { %955 = vmatmul.mubr.bf16.vlgmr.msra.gmra.mrb[0].mxu1 %v1321_v38  ;;  %1444 = vmatpush3.bf16.msra.mxu0 %v1579_v42  ;;  %v1318_v42 = vld [vmem:[%s304_s11] ss:$0 sm:$0xff] }
  0x5a   : > { %1466 = vmatpush3.bf16.msra.mxu1 %v1580_v43  ;;  %1445 = vmatprep.subr.bf16.mxu0 %v1581_v44 }
  0x5b   : > { %1467 = vmatprep.subr.bf16.mxu1 %v1582_v45  ;;  %995 = vmatprep.mubr.bf16.mxu0 %v1324_v11 }
  0x5c   : > { %1036 = vmatprep.mubr.bf16.mxu1 %v1326_v15 }
  0x5d   : > { %1446 = vmatpush3.bf16.msra.mxu0 %v1583_v46  ;;  %v1391_v46 = vld [vmem:[%s304_s11 + $0x1] ss:$0 sm:$0xff] }
  0x5e   : > { %1468 = vmatpush3.bf16.msra.mxu1 %v1584_v47  ;;  %1447 = vmatprep.subr.bf16.mxu0 %v1585_v48 }
  0x5f   : > { %1469 = vmatprep.subr.bf16.mxu1 %v1586_v49  ;;  %v1392_v49 = vld [vmem:[%s304_s11 + $0x2] ss:$0 sm:$0xff] }
  0x61   : > { %1448 = vmatpush3.bf16.msra.mxu0 %v1587_v50 }
  0x62   : > { %1470 = vmatpush3.bf16.msra.mxu1 %v1588_v51  ;;  %1449 = vmatprep.subr.bf16.mxu0 %v1589_v52 }
  0x63   : > { %1471 = vmatprep.subr.bf16.mxu1 %v1590_v53 }
  0x65   : > { %1450 = vmatpush3.bf16.msra.mxu0 %v1591_v54 }
  0x66   : > { %1472 = vmatpush3.bf16.msra.mxu1 %v1592_v55  ;;  %1451 = vmatprep.subr.bf16.mxu0 %v1593_v56 }
  0x67   : > { %1473 = vmatprep.subr.bf16.mxu1 %v1594_v57 }
  0x69   : > { %1452 = vmatpush3.bf16.msra.mxu0 %v1595_v58 }
  0x6a   : > { %1474 = vmatpush3.bf16.msra.mxu1 %v1596_v59  ;;  %1453 = vmatprep.subr.bf16.mxu0 %v1597_v60 }
  0x6b   : > { %1475 = vmatprep.subr.bf16.mxu1 %v1598_v61 }
  0x6d   : > { %1454 = vmatpush3.bf16.msra.mxu0 %v1599_v62 }
  0x6e   : > { %1476 = vmatpush3.bf16.msra.mxu1 %v1600_v63  ;;  %1455 = vmatprep.subr.bf16.mxu0 %v1601_v0 }
  0x6f   : > { %1477 = vmatprep.subr.bf16.mxu1 %v1602_v1 }
  0x71   : > { %1456 = vmatpush3.bf16.msra.mxu0 %v1603_v2 }
  0x72   : > { %1478 = vmatpush3.bf16.msra.mxu1 %v1604_v3  ;;  %1457 = vmatprep.subr.bf16.mxu0 %v1605_v4 }
  0x73   : > { %1479 = vmatprep.subr.bf16.mxu1 %v1606_v5 }
  0x75   : > { %1458 = vmatpush3.bf16.msra.mxu0 %v1607_v6 }
  0x76   : > { %1480 = vmatpush3.bf16.msra.mxu1 %v1608_v7 }
  0x78   : > { %996 = vmatmul.mubr.bf16.vlgmr.msra.gmra.mrb[4].mxu0 %v1323_v10 }
  0x79   : > { %1037 = vmatmul.mubr.bf16.vlgmr.msra.gmra.mrb[4].mxu1 %v1325_v14 }
 0x12b   : > { %v1415_v16 = vpop.f32.mrb[0].mxu0 }
 0x12c   : > { %v1437_v17 = vpop.f32.mrb[0].mxu1  ;;  %v1416_v18 = vpop.f32.mrb[1].mxu0 }
 0x12d   : > { %v1417_v19 = vadd.f32 %v1416_v18, %v1415_v16  ;;  %v1438_v20 = vpop.f32.mrb[1].mxu1  ;;  %v1418_v21 = vpop.f32.mrb[2].mxu0 }
 0x12e   : > { %v1439_v22 = vadd.f32 %v1438_v20, %v1437_v17  ;;  %v1440_v23 = vpop.f32.mrb[2].mxu1  ;;  %v1419_v24 = vpop.f32.mrb[3].mxu0 }
 0x12f   : > { %v1420_v25 = vadd.f32 %v1419_v24, %v1418_v21  ;;  %v1441_v26 = vpop.f32.mrb[3].mxu1 }
 0x130   : > { %v957_v27 = vadd.f32 %v1439_v22, %v1417_v19  ;;  %v1442_v28 = vadd.f32 %v1441_v26, %v1440_v23 }
 0x132   : > { %v960_v29 = vadd.f32 %v1442_v28, %v1420_v25 }
 0x14b   : > { %v1459_v30 = vpop.f32.mrb[4].mxu0 }
 0x14c   : > { %v1481_v31 = vpop.f32.mrb[4].mxu1  ;;  %v1460_v32 = vpop.f32.mrb[5].mxu0 }
 0x14d   : > { %v1461_v33 = vadd.f32 %v1460_v32, %v1459_v30  ;;  %v1482_v34 = vpop.f32.mrb[5].mxu1  ;;  %v1462_v35 = vpop.f32.mrb[6].mxu0 }
 0x14e   : > { %v1483_v36 = vadd.f32 %v1482_v34, %v1481_v31  ;;  %v1484_v37 = vpop.f32.mrb[6].mxu1  ;;  %v1463_v38 = vpop.f32.mrb[7].mxu0 }
 0x14f   : > { %v998_v39 = vadd.f32 %v1461_v33, %v957_v27  ;;  %v1464_v40 = vadd.f32 %v1463_v38, %v1462_v35  ;;  %v1485_v41 = vpop.f32.mrb[7].mxu1 }
 0x150   : > { %v1486_v43 = vadd.f32 %v1485_v41, %v1484_v37 }
 0x151   : > { %v1039_v44 = vadd.f32 %v1483_v36, %v998_v39  ;;  %v1001_v45 = vadd.f32 %v1464_v40, %v960_v29 }
 0x153   : > { %v1045_v47 = vadd.f32 %v1318_v42, %v1039_v44  ;;  %v1042_v48 = vadd.f32 %v1486_v43, %v1001_v45 }
 0x155   : > { %1047 = vst [vmem:[%s281_s23] sm:$0xff] %v1045_v47  ;;  %v1059_v50 = vmul.f32 %v1391_v46, %v1045_v47  ;;  %v1046_v51 = vadd.f32 %v1318_v42, %v1042_v48  ;;  %1080 = sbr.rel (!%p1967_p9) target bundleno = 352 (0x160), region = 48 }
 0x157   : > { %v1066_v52 = vadd.f32 %v1392_v49, %v1059_v50  ;;  %1048 = vst [vmem:[%s281_s23 + $0x8] sm:$0xff] %v1046_v51  ;;  %v1060_v53 = vmul.f32 %v1391_v46, %v1046_v51 }
 0x159   : > { %1068 = vst [vmem:[%s287_s24] sm:$0xff] %v1066_v52  ;;  %v1067_v54 = vadd.f32 %v1392_v49, %v1060_v53 }
 0x15b   : > { %1069 = vst [vmem:[%s287_s24 + $0x8] sm:$0xff] %v1067_v54 }
 0x15c   : > { %v1115_v55 = vld [vmem:[%s281_s23] sm:$0xff] }
 0x15d   : > { %1116 = vst [vmem:[%s1085_s30] sm:$0xff] %v1115_v55 }
 0x15e   : > { %v1117_v56 = vld [vmem:[%s281_s23 + $0x8] sm:$0xff] }
 0x15f   : > { %1118 = vst [vmem:[%s1085_s30 + $0x10] sm:$0xff] %v1117_v56 }
 0x160 PF: > { %p1968_p11 = scmp.ne.s32.totalorder %s1964_s28, 0 }
 0x161   : > { %s1396_s5 = sshll.u32 (%p1968_p11), %s1681_s18, 3 }
 0x162   : > { %1124 = sbr.rel (!%p1968_p11) target bundleno = 361 (0x169), region = 86  ;;  %s1129_s9 = scalar_lea.vmem (%p1968_p11), %s1961_s4, %s1396_s5 }
 0x164   : > { %v1159_v57 = vld [vmem:[%s287_s24] sm:$0xff] (%p1968_p11) }
 0x165   : > { %1160 = vst [vmem:[%s1129_s9] sm:$0xff] (%p1968_p11), %v1159_v57 }
 0x166   : > { %v1161_v58 = vld [vmem:[%s287_s24 + $0x8] sm:$0xff] (%p1968_p11) }
 0x167   : > { %1162 = vst [vmem:[%s1129_s9 + $0x10] sm:$0xff] (%p1968_p11), %v1161_v58 }
 0x169 PF: > { %s18_s20 = sadd.s32 1, %s1689_s20   ;;  %s1969_s15 = smov %s1673_s16 }
 0x16a   : > { %p15_p12 = scmp.ge.s32.totalorder %s18_s20, 4   ;;  %s1970_s16 = smov %s1677_s17 }
 0x16b   : > { %s1971_s17 = smov %s1768_s27  ;;  %s1972_s18 = smov %s1685_s19 }
 0x16c   : > { %s1973_s19 = smov %s1975_s22  ;;  %17 = sbr.rel (!%p15_p12) target bundleno = 4 (0x4), region = 174 }
 0x173   :  { %1185 = vsyncpa [#allocation3], 1 }
 0x174   :  { %1187 = vsyncpa [#allocation3 + $0x1], 1 }

</bundles_post_ra>
